<compile_context>
chip_gen: v6e
topology: v6e:2x2x1
jax: 0.10.0
libtpu: 0.0.40
codegen_flags: <defaults>
</compile_context>

<pallas_src>
import functools

import jax
import jax.numpy as jnp
from jax.experimental import pallas as pl
from jax.experimental.pallas import tpu as pltpu


_VMEM_LIMIT_BYTES = 32 * 1024 * 1024     # explicit scoped-VMEM limit (safe on v5e/v6e/v7x)
_TILE_BUDGET_BYTES = 20 * 1024 * 1024    # target for double-buffered x/out blocks (two-pass)
_FUSED_BUDGET_BYTES = 16 * 1024 * 1024   # max double-buffered footprint for the fused path


# ---------------------------------------------------------------------------
# Kernels
# ---------------------------------------------------------------------------
def _fused_kernel(x_ref, w1t_ref, b1_ref, w2_ref, b2_ref, o_ref, *, hw):
    """Single pass: whole image (1, C, HW) resident in VMEM."""
    x = x_ref[...]                                                     # (1, C, HW)
    # Global average pool over spatial dim (f32 accumulation) -> (C, 1)
    pooled = jnp.sum(x.astype(jnp.float32)[0], axis=-1, keepdims=True) * (1.0 / hw)
    # 1x1 conv #1 (C -> S) on the VPU/XLU: (C,S)*(C,1) -> reduce over C -> (1,S)
    h = jnp.sum(w1t_ref[...] * pooled, axis=0, keepdims=True) + b1_ref[...]
    h = h * jax.nn.sigmoid(h)                                          # Swish
    # 1x1 conv #2 (S -> C): (C,S)*(1,S) -> reduce over S -> (C,1)
    g = jnp.sum(w2_ref[...] * h, axis=1, keepdims=True) + b2_ref[...]
    gate = jax.nn.sigmoid(g)                                           # (C, 1)
    o_ref[...] = (x * gate[None]).astype(o_ref.dtype)                  # (1, C, HW)


def _gate_kernel(x_ref, w1t_ref, b1_ref, w2_ref, b2_ref, gate_ref, sum_ref, *,
                 hw, tile_hw, needs_mask):
    """Two-pass / pass 1: HW-tiled spatial-sum reduction + tiny gate MLP."""
    t = pl.program_id(1)

    @pl.when(t == 0)
    def _init():
        sum_ref[...] = jnp.zeros_like(sum_ref)

    xv = x_ref[...].astype(jnp.float32)                                # (1, C, tile_hw)
    if needs_mask:
        # Last spatial tile is partially out of bounds: zero the padded lanes
        # so they don't perturb the pooled mean.
        col = jax.lax.broadcasted_iota(jnp.int32, xv.shape, 2) + t * tile_hw
        xv = jnp.where(col < hw, xv, 0.0)
    sum_ref[...] += jnp.sum(xv[0], axis=-1, keepdims=True)             # (C, 1)

    @pl.when(t == pl.num_programs(1) - 1)
    def _finalize():
        pooled = sum_ref[...] * (1.0 / hw)                             # (C, 1)
        # 1x1 conv #1 (C -> S), VPU: (C,S)*(C,1) -> reduce over C -> (1,S)
        h = jnp.sum(w1t_ref[...] * pooled, axis=0, keepdims=True) + b1_ref[...]
        h = h * jax.nn.sigmoid(h)                                      # Swish
        # 1x1 conv #2 (S -> C), VPU: (C,S)*(1,S) -> reduce over S -> (C,1)
        g = jnp.sum(w2_ref[...] * h, axis=1, keepdims=True) + b2_ref[...]
        gate_ref[...] = jax.nn.sigmoid(g)[None]                        # (1, C, 1)


def _scale_kernel(x_ref, gate_ref, o_ref):
    """Two-pass / pass 2: lane-dense broadcast multiply out = x * gate."""
    o_ref[...] = (x_ref[...] * gate_ref[...]).astype(o_ref.dtype)


# ---------------------------------------------------------------------------
# Wrapper
# ---------------------------------------------------------------------------
def _round_up(v, m):
    return ((v + m - 1) // m) * m


def _pick_tile_hw(C, HW, itemsize):
    """Largest lane-aligned spatial tile whose double-buffered footprint fits."""
    if HW <= 128:
        return HW                                 # == full array dim, hence legal
    bytes_per_elem = max(itemsize, 4)             # be conservative (f32 accumulation)
    max_tile = _TILE_BUDGET_BYTES // (4 * C * bytes_per_elem)
    max_tile = max(128, (max_tile // 128) * 128)  # multiple of 128 lanes
    return min(_round_up(HW, 128), max_tile)


def sem_forward(x_nchw, w1, b1, w2, b2):
    """SEM forward.  x_nchw: (B,C,H,W); w1: (S,C); b1: (S,); w2: (C,S); b2: (C,)."""
    B, C, H, W = x_nchw.shape
    S = w1.shape[0]
    HW = H * W
    x = x_nchw.reshape(B, C, HW)
    itemsize = jnp.dtype(x.dtype).itemsize

    # Tiny weights, pre-arranged so the in-kernel gate math is pure
    # broadcast-multiply + reduce (no in-kernel transposes, no MXU).
    w1t = jnp.asarray(w1, jnp.float32).T            # (C, S)
    b1r = jnp.asarray(b1, jnp.float32).reshape(1, S)
    w2m = jnp.asarray(w2, jnp.float32).reshape(C, S)
    b2c = jnp.asarray(b2, jnp.float32).reshape(C, 1)

    weight_specs = [
        pl.BlockSpec((C, S), lambda *_: (0, 0)),    # w1^T
        pl.BlockSpec((1, S), lambda *_: (0, 0)),    # b1
        pl.BlockSpec((C, S), lambda *_: (0, 0)),    # w2
        pl.BlockSpec((C, 1), lambda *_: (0, 0)),    # b2
    ]

    fused_footprint = 4 * C * HW * max(itemsize, 4)  # 2x in + 2x out, double buffered
    if (HW % 128 == 0) and (fused_footprint <= _FUSED_BUDGET_BYTES):
        # ---- fused single-pass path: minimal HBM traffic (2x), lane-dense HW ----
        out = pl.pallas_call(
            functools.partial(_fused_kernel, hw=HW),
            out_shape=jax.ShapeDtypeStruct((B, C, HW), x.dtype),
            grid_spec=pltpu.PrefetchScalarGridSpec(
                num_scalar_prefetch=0,
                grid=(B,),
                in_specs=[pl.BlockSpec((1, C, HW), lambda b: (b, 0, 0))] + weight_specs,
                out_specs=pl.BlockSpec((1, C, HW), lambda b: (b, 0, 0)),
            ),
            compiler_params=pltpu.CompilerParams(
                dimension_semantics=("parallel",),
                vmem_limit_bytes=_VMEM_LIMIT_BYTES),
        )(x, w1t, b1r, w2m, b2c)
        return out.reshape(B, C, H, W)

    # ---- two-pass path: HW-tiled reduction for the gate, then scale ----
    tile_hw = _pick_tile_hw(C, HW, itemsize)
    n_t = -(-HW // tile_hw)                       # cdiv
    needs_mask = (HW % tile_hw) != 0

    gate = pl.pallas_call(
        functools.partial(_gate_kernel, hw=HW, tile_hw=tile_hw, needs_mask=needs_mask),
        out_shape=jax.ShapeDtypeStruct((B, C, 1), jnp.float32),
        grid_spec=pltpu.PrefetchScalarGridSpec(
            num_scalar_prefetch=0,
            grid=(B, n_t),
            in_specs=[pl.BlockSpec((1, C, tile_hw), lambda b, t: (b, 0, t))] + weight_specs,
            out_specs=pl.BlockSpec((1, C, 1), lambda b, t: (b, 0, 0)),
            scratch_shapes=[pltpu.VMEM((C, 1), jnp.float32)],
        ),
        compiler_params=pltpu.CompilerParams(
            dimension_semantics=("parallel", "arbitrary"),
            vmem_limit_bytes=_VMEM_LIMIT_BYTES),
    )(x, w1t, b1r, w2m, b2c)

    out = pl.pallas_call(
        _scale_kernel,
        out_shape=jax.ShapeDtypeStruct((B, C, HW), x.dtype),
        grid_spec=pltpu.PrefetchScalarGridSpec(
            num_scalar_prefetch=0,
            grid=(B, n_t),
            in_specs=[
                pl.BlockSpec((1, C, tile_hw), lambda b, t: (b, 0, t)),
                pl.BlockSpec((1, C, 1), lambda b, t: (b, 0, 0)),
            ],
            out_specs=pl.BlockSpec((1, C, tile_hw), lambda b, t: (b, 0, t)),
        ),
        compiler_params=pltpu.CompilerParams(
            dimension_semantics=("parallel", "parallel"),
            vmem_limit_bytes=_VMEM_LIMIT_BYTES),
    )(x, gate)

    return out.reshape(B, C, H, W)


# ---------------------------------------------------------------------------
# Pure-JAX reference (mirrors the PyTorch SEM forward)
# ---------------------------------------------------------------------------
def sem_reference(x_nchw, w1, b1, w2, b2):
    pooled = jnp.mean(x_nchw, axis=(2, 3))                 # (B, C)
    h = pooled @ w1.T + b1                                 # (B, S)
    h = h * jax.nn.sigmoid(h)                              # Swish
    s = h @ w2.T + b2                                      # (B, C)
    gate = jax.nn.sigmoid(s)[:, :, None, None]             # (B, C, 1, 1)
    return x_nchw * gate


if __name__ == "__main__":
    def run_case(key, B, C, H, W, S):
        kx, kw1, kb1, kw2, kb2 = jax.random.split(key, 5)
        x = jax.random.normal(kx, (B, C, H, W), dtype=jnp.float32)
        w1 = jax.random.normal(kw1, (S, C), dtype=jnp.float32) * 0.5   # conv1 (S,C,1,1) squeezed
        b1 = jax.random.normal(kb1, (S,), dtype=jnp.float32) * 0.1
        w2 = jax.random.normal(kw2, (C, S), dtype=jnp.float32) * 0.5   # conv2 (C,S,1,1) squeezed
        b2 = jax.random.normal(kb2, (C,), dtype=jnp.float32) * 0.1

        out = jax.block_until_ready(sem_forward(x, w1, b1, w2, b2))
        ref = sem_reference(x, w1, b1, w2, b2)
        assert out.shape == x.shape
        assert jnp.allclose(out, ref, atol=1e-5, rtol=1e-5), "mismatch vs reference"

    key = jax.random.PRNGKey(0)
    k1, k2 = jax.random.split(key)
    # Lane-aligned spatial size (HW = 256) -> fused single-pass kernel.
    run_case(k1, B=2, C=4, H=16, W=16, S=2)
    # Non-aligned spatial size (HW = 169) -> two-pass tiled path with masked tail.
    run_case(k2, B=2, C=8, H=13, W=13, S=4)

    print("KERNEL_OK")
</pallas_src>

<mosaic_0001>
module attributes {stable_mosaic.version = 11 : i64} {
  func.func @_fused_kernel(%arg0: i32, %arg1: memref<1x4x256xf32, #tpu.memory_space<vmem>>, %arg2: memref<4x2xf32, #tpu.memory_space<vmem>>, %arg3: memref<1x2xf32, #tpu.memory_space<vmem>>, %arg4: memref<4x2xf32, #tpu.memory_space<vmem>>, %arg5: memref<4x1xf32, #tpu.memory_space<vmem>>, %arg6: memref<1x4x256xf32, #tpu.memory_space<vmem>>) attributes {dimension_semantics = [#tpu.dimension_semantics<parallel>], iteration_bounds = array<i64: 2>, scalar_prefetch = 0 : i64, scratch_operands = 0 : i64, tpu.core_type = #tpu.core_type<tc>, window_params = [{transform_indices = @transform_0, window_bounds = array<i64: 1, 4, 256>}, {pipeline_mode = #tpu.pipeline_mode<synchronous>, transform_indices = @transform_1, window_bounds = array<i64: 4, 2>}, {pipeline_mode = #tpu.pipeline_mode<synchronous>, transform_indices = @transform_2, window_bounds = array<i64: 1, 2>}, {pipeline_mode = #tpu.pipeline_mode<synchronous>, transform_indices = @transform_3, window_bounds = array<i64: 4, 2>}, {pipeline_mode = #tpu.pipeline_mode<synchronous>, transform_indices = @transform_4, window_bounds = array<i64: 4, 1>}, {transform_indices = @transform_5, window_bounds = array<i64: 1, 4, 256>}]} {
    %c0 = arith.constant 0 : index
    %c0_0 = arith.constant 0 : index
    %c0_1 = arith.constant 0 : index
    %0 = vector.load %arg1[%c0, %c0_0, %c0_1] : memref<1x4x256xf32, #tpu.memory_space<vmem>>, vector<1x4x256xf32>
    %1 = vector.shape_cast %0 : vector<1x4x256xf32> to vector<4x256xf32>
    %cst = arith.constant dense<0.000000e+00> : vector<4xf32>
    %2 = vector.multi_reduction <add>, %1, %cst [1] : vector<4x256xf32> to vector<4xf32>
    %3 = vector.shape_cast %2 : vector<4xf32> to vector<4x1xf32>
    %cst_2 = arith.constant 3.906250e-03 : f32
    %4 = vector.broadcast %cst_2 : f32 to vector<4x1xf32>
    %5 = arith.mulf %3, %4 : vector<4x1xf32>
    %c0_3 = arith.constant 0 : index
    %c0_4 = arith.constant 0 : index
    %6 = vector.load %arg2[%c0_3, %c0_4] : memref<4x2xf32, #tpu.memory_space<vmem>>, vector<4x2xf32>
    %7 = vector.broadcast %5 : vector<4x1xf32> to vector<4x2xf32>
    %8 = arith.mulf %6, %7 : vector<4x2xf32>
    %cst_5 = arith.constant dense<0.000000e+00> : vector<2xf32>
    %9 = vector.multi_reduction <add>, %8, %cst_5 [0] : vector<4x2xf32> to vector<2xf32>
    %10 = vector.shape_cast %9 : vector<2xf32> to vector<1x2xf32>
    %c0_6 = arith.constant 0 : index
    %c0_7 = arith.constant 0 : index
    %11 = vector.load %arg3[%c0_6, %c0_7] : memref<1x2xf32, #tpu.memory_space<vmem>>, vector<1x2xf32>
    %12 = arith.addf %10, %11 : vector<1x2xf32>
    %13 = arith.negf %12 : vector<1x2xf32>
    %14 = math.exp %13 : vector<1x2xf32>
    %cst_8 = arith.constant 1.000000e+00 : f32
    %15 = vector.broadcast %cst_8 : f32 to vector<1x2xf32>
    %16 = arith.addf %15, %14 : vector<1x2xf32>
    %17 = arith.divf %15, %16 : vector<1x2xf32>
    %18 = arith.mulf %12, %17 : vector<1x2xf32>
    %c0_9 = arith.constant 0 : index
    %c0_10 = arith.constant 0 : index
    %19 = vector.load %arg4[%c0_9, %c0_10] : memref<4x2xf32, #tpu.memory_space<vmem>>, vector<4x2xf32>
    %20 = vector.broadcast %18 : vector<1x2xf32> to vector<4x2xf32>
    %21 = arith.mulf %19, %20 : vector<4x2xf32>
    %cst_11 = arith.constant dense<0.000000e+00> : vector<4xf32>
    %22 = vector.multi_reduction <add>, %21, %cst_11 [1] : vector<4x2xf32> to vector<4xf32>
    %23 = vector.shape_cast %22 : vector<4xf32> to vector<4x1xf32>
    %c0_12 = arith.constant 0 : index
    %c0_13 = arith.constant 0 : index
    %24 = vector.load %arg5[%c0_12, %c0_13] : memref<4x1xf32, #tpu.memory_space<vmem>>, vector<4x1xf32>
    %25 = arith.addf %23, %24 : vector<4x1xf32>
    %26 = arith.negf %25 : vector<4x1xf32>
    %27 = math.exp %26 : vector<4x1xf32>
    %cst_14 = arith.constant 1.000000e+00 : f32
    %28 = vector.broadcast %cst_14 : f32 to vector<4x1xf32>
    %29 = arith.addf %28, %27 : vector<4x1xf32>
    %30 = arith.divf %28, %29 : vector<4x1xf32>
    %31 = vector.shape_cast %30 : vector<4x1xf32> to vector<1x4x1xf32>
    %32 = vector.broadcast %31 : vector<1x4x1xf32> to vector<1x4x256xf32>
    %33 = arith.mulf %0, %32 : vector<1x4x256xf32>
    %c0_15 = arith.constant 0 : index
    %c0_16 = arith.constant 0 : index
    %c0_17 = arith.constant 0 : index
    %34 = vector.load %arg6[%c0_15, %c0_16, %c0_17] : memref<1x4x256xf32, #tpu.memory_space<vmem>>, vector<1x4x256xf32>
    tpu.vector_store %arg6[%c0_15, %c0_16, %c0_17], %33 {strides = array<i32>} : memref<1x4x256xf32, #tpu.memory_space<vmem>>, vector<1x4x256xf32>,
    return
  }
  func.func @transform_0(%arg0: i32) -> (i32, i32, i32) {
    %c0_i32 = arith.constant 0 : i32
    %c0_i32_0 = arith.constant 0 : i32
    %c0_i32_1 = arith.constant 0 : i32
    return %arg0, %c0_i32, %c0_i32_0 : i32, i32, i32
  }
  func.func @transform_1(%arg0: i32) -> (i32, i32) {
    %c0_i32 = arith.constant 0 : i32
    %c0_i32_0 = arith.constant 0 : i32
    %c0_i32_1 = arith.constant 0 : i32
    return %c0_i32, %c0_i32_0 : i32, i32
  }
  func.func @transform_2(%arg0: i32) -> (i32, i32) {
    %c0_i32 = arith.constant 0 : i32
    %c0_i32_0 = arith.constant 0 : i32
    %c0_i32_1 = arith.constant 0 : i32
    return %c0_i32, %c0_i32_0 : i32, i32
  }
  func.func @transform_3(%arg0: i32) -> (i32, i32) {
    %c0_i32 = arith.constant 0 : i32
    %c0_i32_0 = arith.constant 0 : i32
    %c0_i32_1 = arith.constant 0 : i32
    return %c0_i32, %c0_i32_0 : i32, i32
  }
  func.func @transform_4(%arg0: i32) -> (i32, i32) {
    %c0_i32 = arith.constant 0 : i32
    %c0_i32_0 = arith.constant 0 : i32
    %c0_i32_1 = arith.constant 0 : i32
    return %c0_i32, %c0_i32_0 : i32, i32
  }
  func.func @transform_5(%arg0: i32) -> (i32, i32, i32) {
    %c0_i32 = arith.constant 0 : i32
    %c0_i32_0 = arith.constant 0 : i32
    %c0_i32_1 = arith.constant 0 : i32
    return %arg0, %c0_i32, %c0_i32_0 : i32, i32, i32
  }
}

</mosaic_0001>

<bundles_post_ra>
// kernel: tpu_custom_call.1
= control target key start
LH: loop header
LB: loop body
LE: loop exit
PB: predicated region body
PF: predicated region fallthrough
CT: control target
= control target key end

     0   :  { %10 = vsyncpa [#allocation3], 0  ;;  %s622_s0 = inlined_call_operand.vmem [shape: f32[2,4,256], index: 0, kind: input, shape index: {}]   ;;  %s623_s1 = inlined_call_operand.vmem [shape: f32[4,2], index: 1, kind: input, shape index: {}]   ;;  %s624_s2 = inlined_call_operand.vmem [shape: f32[1,2], index: 2, kind: input, shape index: {}]   ;;  %s625_s3 = inlined_call_operand.vmem [shape: f32[4,2], index: 3, kind: input, shape index: {}]   ;;  %s626_s4 = inlined_call_operand.vmem [shape: f32[4,1], index: 4, kind: input, shape index: {}]   ;;  %s627_s5 = inlined_call_operand.hbm [shape: f32[2,4,256], index: 5, kind: output, shape index: {}]  }
   0x1   :  { %12 = vsyncpa [#allocation3 + $0x1], 0  ;;  %s521_s18 = smov 0   ;;  %s523_s19 = smov 0  }
   0x2   :  { %s525_s20 = smov 0   ;;  %s527_s21 = smov 0  }
   0x3 LB: > { %s542_s22 = sadd.s32 4294967295, %s486_s21   ;;  %s358_s23 = sadd.s32 4294967294, %s486_s21   ;;  %s486_s21 = sphi %s527_s21, %s633_s21   ;;  %s482_s20 = sphi %s525_s20, %s632_s20   ;;  %s478_s19 = sphi %s523_s19, %s631_s19   ;;  %s474_s18 = sphi %s521_s18, %s630_s18  }
   0x4   : > { %s546_s24 = sadd.s32 1, %s486_s21   ;;  %s135_s25 = sadd.s32 1, %s482_s20 }
   0x5   : > { %s132_s26 = ssub.s32 %s486_s21, %s546_s24  ;;  %p145_p0 = scmp.ne.s32.totalorder %s482_s20, %s478_s19 }
   0x6   : > { %p133_p1 = scmp.eq.s32.totalorder %s132_s26, 0  ;;  %p146_p2 = scmp.eq.s32.totalorder %s542_s22, 1 }
   0x7   : > { %p151_p3 = scmp.ne.s32.totalorder %s478_s19, %s474_s18  ;;  %p152_p4 = scmp.eq.s32.totalorder %s358_s23, 1 }
   0x8   : > { %s557_s27 = scalar_select %p133_p1, %s482_s20, %s135_s25  }
   0x9   : > { %p559_p5 = por %p146_p2, %p145_p0  ;;  %p563_p6 = por %p152_p4, %p151_p3 }
   0xa   : > { %p361_p7 = scmp.ge.s32.totalorder %s486_s21, 1  ;;  %p190_p8 = scmp.lt.s32.totalorder %s486_s21, 3 }
   0xc   : > { %p191_p9 = pnand %p361_p7, %p190_p8 }
   0xd   : > { %p218_p10 = scmp.lt.s32.totalorder (!%p191_p9), %s542_s22, 1  ;;  %s215_s23 = sand.u32 (!%p191_p9), 1, %s478_s19  }
   0xe   : > { %194 = sbr.rel (%p191_p9) target bundleno = 538 (0x21a), region = 40  ;;  %s362_s25 = sshll.u32 (!%p191_p9), %s215_s23, 3 }
   0xf   : > { %s373_s26 = sshll.u32 (!%p191_p9), %s542_s22, 7  ;;  %s285_s10 = scalar_lea.sflag (!%p191_p9), [#allocation3], %s215_s23 }
  0x10   : > { %s490_s12 = smov (!%p191_p9), [#allocation2]  }
  0x11   : > { %s430_s13 = sshll.u32 (!%p191_p9), %s490_s12, 4  ;;  %s431_s13 = int_to_ptr.vmem [resolvable:$false] %s430_s13 }
  0x13   : > { %s219_s30 = scalar_select %p218_p10, %s542_s22, 1  ;;  %vm227_vm0 = vcmask 1043456   ;;  %v234_v5 = vld [vmem:[%s623_s1] sm:$0xf]  ;;  %vm236_vm1 = vcmask 11264   ;;  %v254_v21 = vlaneseq  ;;  %v488_v30 = vmov 0  }
  0x14   : > { %v244_v15 = vld [vmem:[%s624_s2] sm:$0x1]  ;;  %415 = vset.pattern.permute.xlu1 %v488_v30  ;;  %416 = vset.pattern.permute.xlu0 %v488_v30  ;;  %v489_v38 = vmov 839922192   ;;  %s432_s22 = scalar_lea.vmem %s431_s13, 256 }
  0x15   : > { %s372_s6 = sshll.u32 %s219_s30, 3  ;;  %v255_v22 = vshrl.u32 %v254_v21, 7  ;;  %v253_v26 = vld [vmem:[%s625_s3] sm:$0xf]  ;;  %v275_v39 = vunpack.c.l.s4 %v489_v38  ;;  %s217_s30 = scalar_lea.vmem [#allocation2], %s362_s25 }
  0x16   : > { %s222_s9 = scalar_lea.vmem %s622_s0, %s372_s6  ;;  %v262_v31 = vld [vmem:[%s626_s4] sm:$0xf]  ;;  %s299_s6 = sshll.u32 %s217_s30, 4  ;;  %s300_s6 = int_to_ptr.vmem [resolvable:$true] %s299_s6 }
  0x17   : > { %v223_v0 = vld [vmem:[%s222_s9] sm:$0xff]  ;;  %v256_v23 = vsub.s32 0, %v255_v22  ;;  %v276_v40 = vunpack.c.0.s8 %v275_v39  ;;  %s297_s9 = scalar_lea.hbm %s627_s5, %s373_s26  ;;  %s426_s11 = scalar_lea.vmem %s300_s6, 128 }
  0x18   : > { %v225_v1 = vcombine.high %v223_v0, %v223_v0  ;;  %v228_v2 = vsel %vm227_vm0, %v223_v0, 0.0  ;;  %p427_p11 = scmp.ne.s32.totalorder %s300_s6, %s426_s11  ;;  %p433_p0 = scmp.lt.s32.totalorder %s300_s6, %s431_s13 }
  0x19   : > { %v279_v41 = vsub.s32 %v276_v40, %v255_v22  ;;  %p434_p1 = scmp.lt.s32.totalorder %s432_s22, %s426_s11 }
  0x1a   : > { %v229_v3 = vsel %vm227_vm0, %v225_v1, 0.0  ;;  %p428_p12 = pnand %p427_p11, %p559_p5 }
  0x1b   : > { %v230_v4 = vadd.f32 %v229_v3, %v228_v2  ;;  %p435_p2 = por %p434_p1, %p433_p0 }
  0x1c   : > { %p429_p13 = pneg %p428_p12 }
  0x1d   : > { %231 = vadd.xlane.f32.xlu0 %v230_v4 }
  0x1e   : > { %p436_p3 = pnand %p435_p2, %p429_p13 }
  0xa6   : > { %v232_v6 = vpop.xlane.xlu0 %231 }
  0xa7   : > { %v233_v7 = vmul.f32 0.00390625, %v232_v6 }
  0xa9   : > { %v235_v8 = vmul.f32 %v234_v5, %v233_v7 }
  0xab   : > { %v237_v9 = vsel %vm236_vm1, %v235_v8, 0.0 }
  0xac   : > { %v238_v10 = vrot.slane %v237_v9, 4 }
  0xae   : > { %v239_v11 = vadd.f32 %v238_v10, %v237_v9 }
  0xb0   : > { %v240_v12 = vrot.slane %v239_v11, 2 }
  0xb2   : > { %v241_v13 = vadd.f32 %v240_v12, %v239_v11 }
  0xb4   : > { %v242_v14 = vrot.slane %v241_v13, 1 }
  0xb6   : > { %v243_v16 = vadd.f32 %v242_v14, %v241_v13 }
  0xb8   : > { %v245_v17 = vadd.f32 %v244_v15, %v243_v16 }
  0xba   : > { %v365_v18 = vmul.f32 -1.442695, %v245_v17 }
  0xbc   : > { %418 = vpow2.f32 %v365_v18 }
  0xc9   : > { %v419_v19 = vpop.eup %418 }
  0xca   : > { %v249_v20 = vadd.f32 1.0, %v419_v19 }
  0xcc   : > { %420 = vrcp.f32 %v249_v20 }
  0xd9   : > { %v421_v24 = vpop.eup %420 }
  0xda   : > { %v252_v25 = vmul.f32 %v421_v24, %v245_v17 }
  0xdc   : > { %v257_v27 = vrot.slane %v252_v25, %v256_v23 }
  0xde   : > { %v258_v28 = vmul.f32 %v257_v27, %v253_v26 }
  0xe0   : > { %v259_v29 = vsel %vm236_vm1, %v258_v28, 0.0 }
  0xe1   : > { %260 = vadd.xlane.f32.xlu0 %v259_v29 }
 0x16a   : > { %v261_v32 = vpop.xlane.xlu0 %260 }
 0x16b   : > { %v263_v33 = vadd.f32 %v262_v31, %v261_v32 }
 0x16d   : > { %v366_v34 = vmul.f32 -1.442695, %v263_v33 }
 0x16f   : > { %422 = vpow2.f32 %v366_v34 }
 0x17c   : > { %v423_v35 = vpop.eup %422 }
 0x17d   : > { %v267_v36 = vadd.f32 1.0, %v423_v35 }
 0x17f   : > { %424 = vrcp.f32 %v267_v36 }
 0x18c   : > { %v425_v37 = vpop.eup %424 }
 0x18d   : > { %272 = vperm.xlu1 %415, %v425_v37  }
 0x208   : > { %v273_v42 = vpop.permute.xlu1 %272 }
 0x209   : > { %v280_v43 = vrot.slane %v273_v42, %v279_v41 }
 0x20b   : > { %v282_v44 = vmul.f32 %v280_v43, %v223_v0 }
 0x20d   : > { %283 = vst [vmem:[%s217_s30] sm:$0xff] %v282_v44 }
 0x20e   : > { %439 = shalt.err (!%p436_p3)
}
 0x20f   : > { %s440_s14 = scalar_lea.hbm %s297_s9, 128  ;;  %s444_s17 = scalar_lea.hbm %s627_s5, 256 }
 0x210   : > { %p441_p4 = scmp.ne.s32.totalorder %s297_s9, %s440_s14  ;;  %p445_p9 = scmp.lt.s32.totalorder %s297_s9, %s627_s5 }
 0x211   : > { %p446_p10 = scmp.lt.s32.totalorder %s444_s17, %s440_s14 }
 0x212   : > { %p442_p7 = pnand %p441_p4, %p559_p5 }
 0x213   : > { %p447_p11 = por %p446_p10, %p445_p9 }
 0x214   : > { %p443_p8 = pneg %p442_p7 }
 0x216   : > { %p448_p12 = pnand %p447_p11, %p443_p8 }
 0x218   : > { %451 = shalt.err (!%p448_p12)
}
 0x219   : > { %374 = dma.vmem_to_hbm [thread:$0]  (%p559_p5), %s300_s6, 128, %s297_s9, %s285_s10  }
 0x21a PF: > { %p380_p13 = scmp.ge.s32.totalorder %s486_s21, 2  ;;  %s311_s26 = sand.u32 1, %s474_s18  }
 0x21b   : > { %s312_s30 = scalar_lea.sflag [#allocation3], %s311_s26 }
 0x21c   : > { %p377_p0 = pnand %p380_p13, %p563_p6 }
 0x21e   : > { %p378_p1 = pneg %p377_p0 }
 0x220   : > { %469 = dma.done.wait (%p378_p1), %s312_s30, 128  }
 0x221   : > { %471 = vsyncadd (%p378_p1), %s312_s30, 4294967168  ;;  %p15_p2 = scmp.ge.s32.totalorder %s546_s24, 4   ;;  %s630_s18 = smov %s478_s19 }
 0x222   : > { %s631_s19 = smov %s482_s20  ;;  %s632_s20 = smov %s557_s27 }
 0x223   : > { %s633_s21 = smov %s546_s24  ;;  %17 = sbr.rel (!%p15_p2) target bundleno = 3 (0x3), region = 75 }
 0x228   :  { %317 = vsyncpa [#allocation3], 1 }
 0x229   :  { %319 = vsyncpa [#allocation3 + $0x1], 1 }

</bundles_post_ra>
